<compile_context>
chip_gen: v6e
topology: v6e:2x2x1
jax: 0.10.0
libtpu: 0.0.40
codegen_flags: <defaults>
</compile_context>

<pallas_src>
import functools

import jax
import jax.numpy as jnp
from jax.experimental import pallas as pl
from jax.experimental.pallas import tpu as pltpu


def _round_up(a: int, m: int) -> int:
    return -(-a // m) * m


def _bow_counts(tokens, vt, cdtype):
    # tokens: (RT, N) int32 ids local to this vocab chunk; ids outside
    # [0, vt) match nothing.  Returns (RT, vt) counts in `cdtype`.
    rt, n = tokens.shape
    vocab_iota = jax.lax.broadcasted_iota(jnp.int32, (rt, vt), 1)
    counts = jnp.zeros((rt, vt), cdtype)
    for j in range(n):                      # N is small & static -> unrolled
        counts = counts + (tokens[:, j:j + 1] == vocab_iota).astype(cdtype)
    return counts


def cbow_kernel(x_ref, w_ref, o_ref, acc_ref, *, matmul_dtype=None):
    # x_ref : (RT, N)  int32  token ids; each row is one (batch, subseq) pair
    # w_ref : (VT, D)  float  current vocab chunk of the embedding table
    # o_ref : (RT, D)  float  summed embeddings for these rows
    # acc_ref: (RT, D) f32    scratch accumulator across vocab chunks
    k = pl.program_id(1)
    vt = w_ref.shape[0]
    cdtype = jnp.float32 if matmul_dtype is None else matmul_dtype

    @pl.when(k == 0)
    def _init():
        acc_ref[...] = jnp.zeros_like(acc_ref)

    tokens = x_ref[...] - k * vt                          # chunk-local ids
    counts = _bow_counts(tokens, vt, cdtype)              # (RT, VT)
    w = w_ref[...].astype(cdtype)
    acc_ref[...] += jnp.dot(counts, w, preferred_element_type=jnp.float32)

    @pl.when(k == pl.num_programs(1) - 1)
    def _store():
        o_ref[...] = acc_ref[...].astype(o_ref.dtype)


def cbow_kernel_single(x_ref, w_ref, o_ref, *, matmul_dtype=None):
    # Single vocab chunk: whole table resident, no accumulator needed.
    vt = w_ref.shape[0]
    cdtype = jnp.float32 if matmul_dtype is None else matmul_dtype
    counts = _bow_counts(x_ref[...], vt, cdtype)          # (RT, VT)
    w = w_ref[...].astype(cdtype)
    o_ref[...] = jnp.dot(counts, w,
                         preferred_element_type=jnp.float32).astype(o_ref.dtype)


def cbow_forward(x, weight, *, row_tile=None, vocab_tile=None,
                 matmul_dtype=None):
    """CBOW forward: sum of neighbor embeddings.

    x:      (B, N, S) integer token ids
    weight: (V, D) embedding table (padding_idx row assumed already zeroed)
    returns (B, 1, S, D) == embeddings(x).sum(dim=1, keepdim=True)
    """
    B, N, S = x.shape
    V, D = weight.shape
    M = B * S

    # --- row tile: fill the MXU M dimension (256 = one v6e/v7x pass); fall
    # back to all rows (rounded to the sublane tile) when M is small.
    if row_tile is None:
        row_tile = 256 if M >= 256 else _round_up(M, 8)
    RT = int(row_tile)
    M_pad = _round_up(M, RT)

    # --- vocab tile: bound both the double-buffered W chunk (<= ~2 MiB) and
    # the in-kernel counts footprint (<= ~4 MiB) so everything stays well
    # inside v7x's 64 MiB VMEM; use the whole table when it is small.
    if vocab_tile is None:
        vt_counts = max(128, ((4 << 20) // (RT * 4)) // 128 * 128)
        vt_w = max(128, ((2 << 20) // max(1, D * 4)) // 128 * 128)
        vt = min(vt_counts, vt_w)
        vocab_tile = V if V <= vt else vt
    VT = int(vocab_tile)
    V_pad = _round_up(V, VT)
    num_chunks = V_pad // VT

    # Flatten (batch, subseq) -> rows, neighbors -> columns.  Padded rows use
    # token 0 and their outputs are sliced off; padded vocab rows are zero
    # and are never matched by valid token ids.
    xt = jnp.transpose(x.astype(jnp.int32), (0, 2, 1)).reshape(M, N)
    if M_pad != M:
        xt = jnp.pad(xt, ((0, M_pad - M), (0, 0)))
    w = weight
    if V_pad != V:
        w = jnp.pad(w, ((0, V_pad - V), (0, 0)))

    # Explicit VMEM budget: double-buffered x/W/out blocks + accumulator +
    # counts/iota intermediates, with headroom.
    est = (2 * RT * N * 4 + 2 * VT * D * 4 + 3 * RT * D * 4
           + 3 * RT * VT * 4)
    vmem_limit = int(min(max(2 * est, 32 << 20), 64 << 20))

    if num_chunks == 1:
        kernel = functools.partial(cbow_kernel_single, matmul_dtype=matmul_dtype)
        grid_spec = pltpu.PrefetchScalarGridSpec(
            num_scalar_prefetch=0,
            grid=(M_pad // RT,),
            in_specs=[
                pl.BlockSpec((RT, N), lambda i: (i, 0)),
                pl.BlockSpec((VT, D), lambda i: (0, 0)),
            ],
            out_specs=pl.BlockSpec((RT, D), lambda i: (i, 0)),
        )
        dims = ("parallel",)
    else:
        kernel = functools.partial(cbow_kernel, matmul_dtype=matmul_dtype)
        grid_spec = pltpu.PrefetchScalarGridSpec(
            num_scalar_prefetch=0,
            grid=(M_pad // RT, num_chunks),
            in_specs=[
                pl.BlockSpec((RT, N), lambda i, k: (i, 0)),
                pl.BlockSpec((VT, D), lambda i, k: (k, 0)),
            ],
            out_specs=pl.BlockSpec((RT, D), lambda i, k: (i, 0)),
            scratch_shapes=[pltpu.VMEM((RT, D), jnp.float32)],
        )
        dims = ("parallel", "arbitrary")

    out2d = pl.pallas_call(
        kernel,
        out_shape=jax.ShapeDtypeStruct((M_pad, D), weight.dtype),
        grid_spec=grid_spec,
        compiler_params=pltpu.CompilerParams(
            dimension_semantics=dims,
            vmem_limit_bytes=vmem_limit,
        ),
    )(xt, w)

    return out2d[:M].reshape(B, 1, S, D)


def make_embedding_weight(key, vocab_size, embed_dim, padding_idx):
    # nn.Embedding default init: N(0, 1); padding_idx row zeroed.
    w = jax.random.normal(key, (vocab_size, embed_dim), dtype=jnp.float32)
    return w.at[padding_idx].set(0.0)


def _reference(x, weight):
    return jnp.take(weight, x, axis=0).sum(axis=1, keepdims=True)


if __name__ == "__main__":
    key = jax.random.PRNGKey(0)
    k_w, k_x, k_w2, k_x2 = jax.random.split(key, 4)

    # --- small shapes matching the module's forward signature ---------------
    B, N, S = 2, 4, 8           # batch, neighbor_size, #subsequence
    V, D = 64, 32               # vocab_size, embed_dim
    padding_idx = 0             # NlpContext default padding index

    weight = make_embedding_weight(k_w, V, D, padding_idx)
    x = jax.random.randint(k_x, (B, N, S), 0, V, dtype=jnp.int32)

    out = jax.block_until_ready(cbow_forward(x, weight))
    assert out.shape == (B, 1, S, D), out.shape
    assert jnp.allclose(out, _reference(x, weight), atol=1e-5, rtol=1e-5)

    # --- second config exercising row-tiling, vocab-chunking and padding ----
    B2, N2, S2 = 40, 5, 7
    V2, D2 = 1000, 48
    weight2 = make_embedding_weight(k_w2, V2, D2, padding_idx)
    x2 = jax.random.randint(k_x2, (B2, N2, S2), 0, V2, dtype=jnp.int32)

    out2 = jax.block_until_ready(cbow_forward(x2, weight2, vocab_tile=256))
    assert out2.shape == (B2, 1, S2, D2), out2.shape
    assert jnp.allclose(out2, _reference(x2, weight2), atol=1e-4, rtol=1e-4)

    print("KERNEL_OK")
</pallas_src>

<mosaic_0001>
module attributes {stable_mosaic.version = 11 : i64} {
  func.func @cbow_kernel_single(%arg0: i32, %arg1: memref<16x4xi32, #tpu.memory_space<vmem>>, %arg2: memref<64x32xf32, #tpu.memory_space<vmem>>, %arg3: memref<16x32xf32, #tpu.memory_space<vmem>>) attributes {dimension_semantics = [#tpu.dimension_semantics<parallel>], iteration_bounds = array<i64: 1>, scalar_prefetch = 0 : i64, scratch_operands = 0 : i64, tpu.core_type = #tpu.core_type<tc>, window_params = [{transform_indices = @transform_0, window_bounds = array<i64: 16, 4>}, {pipeline_mode = #tpu.pipeline_mode<synchronous>, transform_indices = @transform_1, window_bounds = array<i64: 64, 32>}, {transform_indices = @transform_2, window_bounds = array<i64: 16, 32>}]} {
    %c0 = arith.constant 0 : index
    %c0_0 = arith.constant 0 : index
    %0 = vector.load %arg1[%c0, %c0_0] : memref<16x4xi32, #tpu.memory_space<vmem>>, vector<16x4xi32>
    %1 = tpu.iota {dimensions = array<i32: 1>} : vector<16x64xi32>
    %cst = arith.constant 0.000000e+00 : f32
    %2 = vector.broadcast %cst : f32 to vector<16x64xf32>
    %3 = vector.extract_strided_slice %0 {offsets = [0, 0], sizes = [16, 1], strides = [1, 1]} : vector<16x4xi32> to vector<16x1xi32>
    %4 = vector.broadcast %3 : vector<16x1xi32> to vector<16x64xi32>
    %5 = arith.cmpi eq, %4, %1 : vector<16x64xi32>
    %6 = arith.extui %5 : vector<16x64xi1> to vector<16x64xi32>
    %7 = arith.sitofp %6 : vector<16x64xi32> to vector<16x64xf32>
    %8 = arith.addf %2, %7 : vector<16x64xf32>
    %9 = vector.extract_strided_slice %0 {offsets = [0, 1], sizes = [16, 1], strides = [1, 1]} : vector<16x4xi32> to vector<16x1xi32>
    %10 = vector.broadcast %9 : vector<16x1xi32> to vector<16x64xi32>
    %11 = arith.cmpi eq, %10, %1 : vector<16x64xi32>
    %12 = arith.extui %11 : vector<16x64xi1> to vector<16x64xi32>
    %13 = arith.sitofp %12 : vector<16x64xi32> to vector<16x64xf32>
    %14 = arith.addf %8, %13 : vector<16x64xf32>
    %15 = vector.extract_strided_slice %0 {offsets = [0, 2], sizes = [16, 1], strides = [1, 1]} : vector<16x4xi32> to vector<16x1xi32>
    %16 = vector.broadcast %15 : vector<16x1xi32> to vector<16x64xi32>
    %17 = arith.cmpi eq, %16, %1 : vector<16x64xi32>
    %18 = arith.extui %17 : vector<16x64xi1> to vector<16x64xi32>
    %19 = arith.sitofp %18 : vector<16x64xi32> to vector<16x64xf32>
    %20 = arith.addf %14, %19 : vector<16x64xf32>
    %21 = vector.extract_strided_slice %0 {offsets = [0, 3], sizes = [16, 1], strides = [1, 1]} : vector<16x4xi32> to vector<16x1xi32>
    %22 = vector.broadcast %21 : vector<16x1xi32> to vector<16x64xi32>
    %23 = arith.cmpi eq, %22, %1 : vector<16x64xi32>
    %24 = arith.extui %23 : vector<16x64xi1> to vector<16x64xi32>
    %25 = arith.sitofp %24 : vector<16x64xi32> to vector<16x64xf32>
    %26 = arith.addf %20, %25 : vector<16x64xf32>
    %c0_1 = arith.constant 0 : index
    %c0_2 = arith.constant 0 : index
    %27 = vector.load %arg2[%c0_1, %c0_2] : memref<64x32xf32, #tpu.memory_space<vmem>>, vector<64x32xf32>
    %cst_3 = arith.constant dense<0.000000e+00> : vector<16x32xf32>
    %28 = tpu.matmul %26, %27, %cst_3 {dimension_numbers = #tpu.dot_dimension_numbers<[1], [0], [0], [1], [0, 0, 1, 1], [], []>} : vector<16x64xf32>, vector<64x32xf32>, vector<16x32xf32> -> vector<16x32xf32>
    %c0_4 = arith.constant 0 : index
    %c0_5 = arith.constant 0 : index
    %29 = vector.load %arg3[%c0_4, %c0_5] : memref<16x32xf32, #tpu.memory_space<vmem>>, vector<16x32xf32>
    tpu.vector_store %arg3[%c0_4, %c0_5], %28 {strides = array<i32>} : memref<16x32xf32, #tpu.memory_space<vmem>>, vector<16x32xf32>,
    return
  }
  func.func @transform_0(%arg0: i32) -> (i32, i32) {
    %c0_i32 = arith.constant 0 : i32
    %c0_i32_0 = arith.constant 0 : i32
    return %arg0, %c0_i32 : i32, i32
  }
  func.func @transform_1(%arg0: i32) -> (i32, i32) {
    %c0_i32 = arith.constant 0 : i32
    %c0_i32_0 = arith.constant 0 : i32
    %c0_i32_1 = arith.constant 0 : i32
    return %c0_i32, %c0_i32_0 : i32, i32
  }
  func.func @transform_2(%arg0: i32) -> (i32, i32) {
    %c0_i32 = arith.constant 0 : i32
    %c0_i32_0 = arith.constant 0 : i32
    return %arg0, %c0_i32 : i32, i32
  }
}

</mosaic_0001>

<bundles_post_ra>
// kernel: tpu_custom_call.1
= control target key start
LH: loop header
LB: loop body
LE: loop exit
PB: predicated region body
PF: predicated region fallthrough
CT: control target
= control target key end

     0   :  { %v258_v2 = vmov 0   ;;  %s314_s0 = inlined_call_operand.vmem [shape: s32[16,4], index: 0, kind: input, shape index: {}]   ;;  %s315_s1 = inlined_call_operand.vmem [shape: f32[64,32], index: 1, kind: input, shape index: {}]   ;;  %s316_s2 = inlined_call_operand.hbm [shape: f32[16,32], index: 2, kind: output, shape index: {}]  }
   0x1   :  { %v13_v0 = vld [vmem:[%s314_s0 + $0x8] sm:$0xff]  ;;  %v12_v1 = vld [vmem:[%s314_s0] sm:$0xff]  ;;  %230 = vset.pattern.permute.xlu1 %v258_v2  ;;  %228 = vset.pattern.permute.xlu0 %v258_v2 }
   0x2   :  { %7 = vsyncpa [#allocation3], 0  ;;  %20 = vperm.xlu1 %230, %v13_v0   ;;  %17 = vperm.xlu0 %228, %v12_v1   ;;  %v79_v3 = vld [vmem:[%s315_s1 + $0x38] sm:$0xff]  ;;  %v259_v4 = vmov 1   ;;  %v78_v5 = vld [vmem:[%s315_s1 + $0x30] sm:$0xff]  ;;  %v260_v7 = vmov 2   ;;  %v14_v14 = vlaneseq }
   0x3   :  { %201 = vmatprep.subr.mxu0 %v79_v3  ;;  %v77_v6 = vld [vmem:[%s315_s1 + $0x28] sm:$0xff]  ;;  %v76_v8 = vld [vmem:[%s315_s1 + $0x20] sm:$0xff]  ;;  %v75_v9 = vld [vmem:[%s315_s1 + $0x18] sm:$0xff]  ;;  %v261_v10 = vmov 3   ;;  %v262_v20 = vmov 0.0   ;;  %vm80_vm7 = vcmask 523264  }
   0x4   :  { %202 = vmatpush3.msra.mxu0 %v79_v3  ;;  %v74_v11 = vld [vmem:[%s315_s1 + $0x10] sm:$0xff]  ;;  %v73_v12 = vld [vmem:[%s315_s1 + $0x8] sm:$0xff]  ;;  %v72_v13 = vld [vmem:[%s315_s1] sm:$0xff]  ;;  %v15_v17 = vand.u32 127, %v14_v14  ;;  %s263_s1 = smov [#allocation2]   ;;  %vm162_vm9 = vcmask 261120  }
   0x5   :  { %203 = vmatprep.subr.mxu0 %v78_v5  ;;  %s170_s28 = sshll.u32 %s263_s1, 4  ;;  %s171_s28 = int_to_ptr.vmem [resolvable:$true] %s170_s28 }
   0x6   :  { %231 = vset.pattern.permute.xlu1 %v259_v4  ;;  %229 = vset.pattern.permute.xlu0 %v259_v4  ;;  %s236_s29 = scalar_lea.vmem %s171_s28, 256  ;;  %p241_p1 = scmp.lt.s32.totalorder %s171_s28, %s171_s28 }
   0x7   :  { %34 = vperm.xlu1 %231, %v13_v0   ;;  %31 = vperm.xlu0 %229, %v12_v1   ;;  %p237_p0 = scmp.ne.s32.totalorder %s171_s28, %s236_s29  ;;  %p242_p2 = scmp.lt.s32.totalorder %s236_s29, %s236_s29 }
   0x8   :  { %204 = vmatpush3.msra.mxu0 %v78_v5 }
   0x9   :  { %205 = vmatprep.subr.mxu0 %v77_v6  ;;  %p243_p3 = por %p242_p2, %p241_p1 }
   0xa   :  { %206 = vmatpush3.msra.mxu0 %v77_v6 }
   0xb   :  { %232 = vset.pattern.permute.xlu1 %v260_v7  ;;  %233 = vset.pattern.permute.xlu0 %v260_v7  ;;  %p244_p4 = pnand %p243_p3, %p237_p0 }
   0xc   :  { %45 = vperm.xlu1 %232, %v12_v1   ;;  %48 = vperm.xlu0 %233, %v13_v0  }
   0xd   :  { %207 = vmatprep.subr.mxu0 %v76_v8 }
   0xe   :  { %208 = vmatpush3.msra.mxu0 %v76_v8 }
   0xf   :  { %209 = vmatprep.subr.mxu0 %v75_v9 }
  0x10   :  { %234 = vset.pattern.permute.xlu1 %v261_v10  ;;  %210 = vmatpush3.msra.mxu0 %v75_v9 }
  0x11   :  { %59 = vperm.xlu1 %234, %v12_v1   ;;  %235 = vset.pattern.permute.xlu0 %v261_v10 }
  0x12   :  { %211 = vmatprep.subr.mxu0 %v74_v11 }
  0x13   :  { %212 = vmatpush3.msra.mxu0 %v74_v11 }
  0x14   :  { %213 = vmatprep.subr.mxu0 %v73_v12 }
  0x15   :  { %62 = vperm.xlu1 %234, %v13_v0   ;;  %214 = vmatpush3.msra.mxu0 %v73_v12 }
  0x16   :  { %215 = vmatprep.subr.mxu0 %v72_v13 }
  0x17   :  { %216 = vmatpush3.msra.mxu0 %v72_v13 }
  0x7d   :  { %v21_v15 = vpop.permute.xlu1 %20  ;;  %v18_v16 = vpop.permute.xlu0 %17 }
  0x7e   :  { %vm22_vm0 = vcmp.eq.s32.totalorder %v18_v16, %v15_v17  ;;  %vm23_vm4 = vcmp.eq.s32.totalorder %v21_v15, %v15_v17 }
  0x7f   :  { %v181_v21 = vsel %vm22_vm0, 1.0, %v262_v20  ;;  %v182_v30 = vsel %vm23_vm4, 1.0, %v262_v20 }
  0x82   :  { %v35_v18 = vpop.permute.xlu1 %34  ;;  %v32_v19 = vpop.permute.xlu0 %31 }
  0x83   :  { %vm36_vm1 = vcmp.eq.s32.totalorder %v32_v19, %v15_v17  ;;  %vm37_vm3 = vcmp.eq.s32.totalorder %v35_v18, %v15_v17 }
  0x84   :  { %v183_v22 = vsel %vm36_vm1, 1.0, %v262_v20  ;;  %v184_v27 = vsel %vm37_vm3, 1.0, %v262_v20 }
  0x85   :  { %v42_v25 = vadd.f32 %v183_v22, %v181_v21  ;;  %v43_v33 = vadd.f32 %v184_v27, %v182_v30 }
  0x87   :  { %v46_v23 = vpop.permute.xlu1 %45  ;;  %v49_v24 = vpop.permute.xlu0 %48 }
  0x88   :  { %vm50_vm2 = vcmp.eq.s32.totalorder %v46_v23, %v15_v17  ;;  %vm51_vm5 = vcmp.eq.s32.totalorder %v49_v24, %v15_v17 }
  0x89   :  { %v185_v26 = vsel %vm50_vm2, 1.0, %v262_v20  ;;  %v186_v31 = vsel %vm51_vm5, 1.0, %v262_v20 }
  0x8a   :  { %v56_v29 = vadd.f32 %v185_v26, %v42_v25  ;;  %v57_v36 = vadd.f32 %v186_v31, %v43_v33 }
  0x8c   :  { %v60_v28 = vpop.permute.xlu1 %59 }
  0x8d   :  { %vm64_vm6 = vcmp.eq.s32.totalorder %v60_v28, %v15_v17 }
  0x8e   :  { %v187_v32 = vsel %vm64_vm6, 1.0, %v262_v20 }
  0x8f   :  { %v70_v34 = vadd.f32 %v187_v32, %v56_v29 }
  0x90   :  { %v63_v35 = vpop.permute.xlu1 %62 }
  0x91   :  { %vm65_vm8 = vcmp.eq.s32.totalorder %v63_v35, %v15_v17  ;;  %217 = vmatprep.mubr.msk.f32.mxu0 %vm80_vm7, %v70_v34 }
  0x92   :  { %v188_v37 = vsel %vm65_vm8, 1.0, %v262_v20 }
  0x93   :  { %v71_v38 = vadd.f32 %v188_v37, %v57_v36 }
  0x95   :  { %218 = vmatmul.mubr.msk.f32.vlgmr.msra.gmra.mxu0 %vm80_vm7, %v71_v38 }
 0x155   :  { %v219_v39 = vpop.f32.mrf.mxu0 }
 0x156   :  { %164 = vst.msk [vmem:[#allocation2 + $0x8] sm:$0xff] %vm162_vm9, %v219_v39 }
 0x157   :  { %v153_v40 = vpop.f32.mrf.mxu0 }
 0x158   :  { %163 = vst.msk [vmem:[#allocation2] sm:$0xff] %vm162_vm9, %v153_v40 }
 0x159   :  { %247 = shalt.err (!%p244_p4)
}
 0x15a   :  { %s264_s30 = smov 128   ;;  %s265_s3 = smov 8  }
 0x15b   :  { %176 = dma.vmem_to_hbm [thread:$0]  %s171_s28, 256, %s316_s2, [#allocation3], %s264_s30, %s264_s30, %s265_s3  }
 0x15c   :  { %256 = dma.done.wait [#allocation3], 256  }
 0x15d   :  { %257 = vsyncadd [#allocation3], 4294967040 }
 0x15e   :  { %180 = vsyncpa [#allocation3], 1 }

</bundles_post_ra>
